<compile_context>
chip_gen: v5e
topology: v5e:2x2
jax: 0.10.0
libtpu: 0.0.40
codegen_flags: <defaults>
</compile_context>

<pallas_src>
import math

import jax
import jax.numpy as jnp
from jax.experimental import pallas as pl
from jax.experimental.pallas import tpu as pltpu

LN_EPS = 1e-5                 # s2s_ft BertLayerNorm epsilon
_INV_SQRT2 = 0.7071067811865476


def _gelu_exact(x):
    # erf-based gelu (matches the torch implementation used by s2s_ft)
    return x * 0.5 * (1.0 + jax.lax.erf(x * _INV_SQRT2))


def _round_up(x, m):
    return ((x + m - 1) // m) * m


def _vmem_capacity_bytes():
    try:
        cap = int(pltpu.get_tpu_info().vmem_capacity_bytes)
        if cap >= 16 * 1024 * 1024:
            return cap
    except Exception:
        pass
    return 64 * 1024 * 1024          # conservative (v7x-sized) default


def _default_tm():
    # v5e is already MXU-bound at tm=512 (compute-bound threshold ~240
    # FLOP/byte vs the decoder-weight stream); bigger tiles only add VMEM and
    # per-step latency there.  v6e/v7x need tm around 620-650 to beat the
    # decoder-weight HBM stream, so default to 1024.
    try:
        kind = jax.devices()[0].device_kind.lower()
    except Exception:
        kind = ""
    if "v5 lite" in kind or "v5e" in kind or "v5lite" in kind:
        return 512
    return 1024


def prepare_lm_head_params(params, compute_dtype=jnp.bfloat16):
    """One-time (model-load) weight prep.

    Casts the MXU operands to the compute dtype and gives the small vectors a
    (1, N) layout.  Weights keep their PyTorch (out, in) layout — the kernel
    contracts on axis 1 of both matmul operands ("NT" matmuls), so the ~V*H
    decoder weight is never transposed, padded or re-cast in the hot path.
    """
    cdt = jnp.dtype(compute_dtype)
    f32 = jnp.float32
    return {
        "dense_weight": jnp.asarray(params["dense_weight"], cdt),      # (H, H)
        "dense_bias": jnp.asarray(params["dense_bias"], f32).reshape(1, -1),
        "ln_weight": jnp.asarray(params["ln_weight"], f32).reshape(1, -1),
        "ln_bias": jnp.asarray(params["ln_bias"], f32).reshape(1, -1),
        "decoder_weight": jnp.asarray(params["decoder_weight"], cdt),  # (V, H)
        "bias": jnp.asarray(params["bias"], f32).reshape(1, -1),       # (1, V)
    }


def _lm_head_kernel(x_ref, w1_ref, b1_ref, g_ref, beta_ref,
                    wd_ref, bv_ref, o_ref, t_ref):
    # grid = (cdiv(M,tm), cdiv(V,tv)); the vocab axis (1) is innermost, so the
    # transform of the current row tile is computed once at j == 0, cached in
    # the VMEM scratch t_ref, and reused for every vocab tile.
    @pl.when(pl.program_id(1) == 0)
    def _():
        # x @ W1^T : contract axis 1 of both operands (W1 is (H_out, H_in)).
        h = jax.lax.dot_general(
            x_ref[...], w1_ref[...],
            dimension_numbers=(((1,), (1,)), ((), ())),
            preferred_element_type=jnp.float32)
        h = _gelu_exact(h + b1_ref[...])              # bias + gelu in f32
        # LayerNorm in f32, centered two-pass variance.
        mu = jnp.mean(h, axis=-1, keepdims=True)
        d = h - mu
        var = jnp.mean(d * d, axis=-1, keepdims=True)
        hn = d * jax.lax.rsqrt(var + LN_EPS)
        t_ref[...] = (hn * g_ref[...] + beta_ref[...]).astype(t_ref.dtype)

    # h @ decoder_weight^T for this vocab tile; wd tile is (tv, H), so again
    # contract axis 1 of both operands — no transpose anywhere.
    logits = jax.lax.dot_general(
        t_ref[...], wd_ref[...],
        dimension_numbers=(((1,), (1,)), ((), ())),
        preferred_element_type=jnp.float32)
    o_ref[...] = (logits + bv_ref[...]).astype(o_ref.dtype)


def bert_lm_prediction_head(hidden_states, params, *, tm=None, tv=None,
                            out_dtype=None, min_row_tiles=1,
                            single_buffer_invariants=True):
    """BertLMPredictionHead forward: [B, S, H] -> logits [B, S, V].

    `params` should come from prepare_lm_head_params() (call once at model
    load); raw 1-D-bias params are also accepted and prepped on the fly.
    On v7x pass min_row_tiles=2 so both TensorCores get a row tile.
    """
    B, S, H = hidden_states.shape
    if params["dense_bias"].ndim != 2:
        # Convenience path only — in production prep once outside the hot path.
        params = prepare_lm_head_params(params)
    w1, b1 = params["dense_weight"], params["dense_bias"]
    gamma, beta = params["ln_weight"], params["ln_bias"]
    wd, bv = params["decoder_weight"], params["bias"]
    V = wd.shape[0]
    M = B * S
    cdt = jnp.dtype(wd.dtype)
    odt = jnp.dtype(hidden_states.dtype if out_dtype is None else out_dtype)

    # ---- tile sizes (roofline-driven, generation-aware) ---------------------
    if tm is None:
        tm = _default_tm()
    if tv is None:
        tv = 1024
    tm = max(8, min(int(tm), _round_up(M, 8)))
    tv = max(128, min(int(tv), _round_up(V, 128)))
    # v7x megacore: ensure >= min_row_tiles row tiles on the "parallel" axis.
    while min_row_tiles > 1 and pl.cdiv(M, tm) < min_row_tiles and tm > 8:
        tm = max(8, _round_up(tm // 2, 8))

    # ---- VMEM budget (double-buffered tiles + scratch + f32 temporaries) ----
    vmem_cap = _vmem_capacity_bytes()
    budget = int(vmem_cap * 0.85)

    def _vmem_estimate(tm_, tv_):
        c = cdt.itemsize
        o = odt.itemsize
        inv_bufs = 1 if single_buffer_invariants else 2
        return (2 * tm_ * H * c                       # x row tile
                + inv_bufs * (H * H * c + 3 * H * 4)  # dense W + b1/gamma/beta
                + 2 * tv_ * H * c                     # decoder weight tile
                + 2 * tv_ * 4                         # vocab bias tile
                + 2 * tm_ * tv_ * o                   # output tile
                + tm_ * H * c                         # cached transform scratch
                + 2 * tm_ * H * 4)                    # f32 GELU/LN temporaries

    while _vmem_estimate(tm, tv) > budget and max(tm, tv) > 256:
        if tv >= tm:
            tv = max(128, _round_up(tv // 2, 128))
        else:
            tm = max(8, _round_up(tm // 2, 8))
    vmem_limit = min(max(int(_vmem_estimate(tm, tv) * 5 // 4),
                         32 * 1024 * 1024), budget)

    grid = (pl.cdiv(M, tm), pl.cdiv(V, tv))           # ragged edges are clipped
    x_c = hidden_states.reshape(M, H).astype(cdt)     # the only per-call cast

    def _build(single_buffer):
        inv_kw = {"pipeline_mode": pl.Buffered(1)} if single_buffer else {}
        in_specs = [
            pl.BlockSpec((tm, H), lambda i, j: (i, 0)),            # x row tile
            pl.BlockSpec((H, H), lambda i, j: (0, 0), **inv_kw),   # dense W
            pl.BlockSpec((1, H), lambda i, j: (0, 0), **inv_kw),   # dense bias
            pl.BlockSpec((1, H), lambda i, j: (0, 0), **inv_kw),   # LN gamma
            pl.BlockSpec((1, H), lambda i, j: (0, 0), **inv_kw),   # LN beta
            pl.BlockSpec((tv, H), lambda i, j: (j, 0)),            # decoder W tile
            pl.BlockSpec((1, tv), lambda i, j: (0, j)),            # vocab bias tile
        ]
        return pl.pallas_call(
            _lm_head_kernel,
            out_shape=jax.ShapeDtypeStruct((M, V), odt),
            grid_spec=pltpu.PrefetchScalarGridSpec(
                num_scalar_prefetch=0,
                grid=grid,
                in_specs=in_specs,
                out_specs=pl.BlockSpec((tm, tv), lambda i, j: (i, j)),
                scratch_shapes=[pltpu.VMEM((tm, H), cdt)],
            ),
            compiler_params=pltpu.CompilerParams(
                dimension_semantics=("parallel", "arbitrary"),
                vmem_limit_bytes=vmem_limit),
        )

    try:
        out = _build(single_buffer_invariants)(x_c, w1, b1, gamma, beta, wd, bv)
    except Exception:
        if not single_buffer_invariants:
            raise
        # Fallback for environments without BlockSpec pipeline_mode support.
        out = _build(False)(x_c, w1, b1, gamma, beta, wd, bv)

    return out.reshape(B, S, V)        # metadata-only reshape; no pad, no slice


def _reference(hidden_states, params):
    # Accurate-f32 ground truth (the PyTorch module runs plain f32 matmuls).
    with jax.default_matmul_precision("highest"):
        h = hidden_states.astype(jnp.float32)
        h = h @ params["dense_weight"].T + params["dense_bias"]
        h = _gelu_exact(h)
        mu = jnp.mean(h, axis=-1, keepdims=True)
        var = jnp.mean((h - mu) ** 2, axis=-1, keepdims=True)
        h = (h - mu) * jax.lax.rsqrt(var + LN_EPS)
        h = h * params["ln_weight"] + params["ln_bias"]
        return h @ params["decoder_weight"].T + params["bias"]


if __name__ == "__main__":
    # Small synthetic config.  M = B*S = 18 (not a multiple of 8) and V = 250
    # (not a multiple of 128) deliberately exercise the ragged-edge
    # (non-dividing grid) path that replaced the old pad + slice.
    B, S, H, V = 2, 9, 32, 250

    key = jax.random.PRNGKey(0)
    k_x, k_w1, k_b1, k_g, k_bt, k_dec, k_bv = jax.random.split(key, 7)

    hidden_states = jax.random.normal(k_x, (B, S, H), dtype=jnp.float32)

    params = {
        # BertPredictionHeadTransform.dense: Linear(H, H), (out, in) layout
        "dense_weight": jax.random.normal(k_w1, (H, H), jnp.float32) * (1.0 / math.sqrt(H)),
        "dense_bias": jax.random.normal(k_b1, (H,), jnp.float32) * 0.02,
        # BertLayerNorm(H)
        "ln_weight": 1.0 + 0.1 * jax.random.normal(k_g, (H,), jnp.float32),
        "ln_bias": 0.05 * jax.random.normal(k_bt, (H,), jnp.float32),
        # decoder_weight: tied embedding matrix, shape (vocab_size, hidden)
        "decoder_weight": jax.random.normal(k_dec, (V, H), jnp.float32) * 0.02,
        # self.bias = nn.Parameter(torch.zeros(vocab_size)) (perturbed here)
        "bias": 0.01 * jax.random.normal(k_bv, (V,), jnp.float32),
    }

    ref = _reference(hidden_states, params)

    # 1) f32 compute path with small explicit tiles -> multi-tile grid with
    #    ragged row AND vocab edge tiles (validates the no-pad/no-slice path).
    #    Tolerance covers the XLA-vs-Mosaic f32-matmul precision difference.
    prepped_f32 = prepare_lm_head_params(params, compute_dtype=jnp.float32)
    out_f32 = jax.block_until_ready(
        bert_lm_prediction_head(hidden_states, prepped_f32, tm=8, tv=128))
    assert out_f32.shape == (B, S, V)
    assert bool(jnp.all(jnp.isfinite(out_f32)))
    assert jnp.allclose(out_f32, ref, atol=5e-3, rtol=5e-3), "f32 mismatch vs reference"

    # 2) default production path: bf16 MXU operands (prepped once), auto tiles.
    prepped = prepare_lm_head_params(params)     # do this once at model load
    out_bf16 = jax.block_until_ready(bert_lm_prediction_head(hidden_states, prepped))
    assert out_bf16.shape == (B, S, V)
    assert bool(jnp.all(jnp.isfinite(out_bf16)))
    assert jnp.allclose(out_bf16, ref, atol=3e-2, rtol=3e-2), "bf16 mismatch vs reference"

    # 3) bf16 logits output + v7x-style min_row_tiles=2 row-tile split.
    out_b = jax.block_until_ready(
        bert_lm_prediction_head(hidden_states, prepped,
                                out_dtype=jnp.bfloat16, min_row_tiles=2))
    assert out_b.shape == (B, S, V) and out_b.dtype == jnp.bfloat16
    assert jnp.allclose(out_b.astype(jnp.float32), ref, atol=5e-2, rtol=5e-2), \
        "bf16-output mismatch vs reference"

    print("KERNEL_OK")
</pallas_src>

<mosaic_0001>
module attributes {stable_mosaic.version = 11 : i64} {
  func.func @_lm_head_kernel(%arg0: i32, %arg1: i32, %arg2: memref<8x32xf32, #tpu.memory_space<vmem>>, %arg3: memref<32x32xf32, #tpu.memory_space<vmem>>, %arg4: memref<1x32xf32, #tpu.memory_space<vmem>>, %arg5: memref<1x32xf32, #tpu.memory_space<vmem>>, %arg6: memref<1x32xf32, #tpu.memory_space<vmem>>, %arg7: memref<128x32xf32, #tpu.memory_space<vmem>>, %arg8: memref<1x128xf32, #tpu.memory_space<vmem>>, %arg9: memref<8x128xf32, #tpu.memory_space<vmem>>, %arg10: memref<8x32xf32, #tpu.memory_space<vmem>>) attributes {dimension_semantics = [#tpu.dimension_semantics<parallel>, #tpu.dimension_semantics<arbitrary>], iteration_bounds = array<i64: 3, 2>, scalar_prefetch = 0 : i64, scratch_operands = 1 : i64, tpu.core_type = #tpu.core_type<tc>, window_params = [{transform_indices = @transform_0, window_bounds = array<i64: 8, 32>}, {pipeline_mode = #tpu.pipeline_mode<synchronous>, transform_indices = @transform_1, window_bounds = array<i64: 32, 32>}, {pipeline_mode = #tpu.pipeline_mode<synchronous>, transform_indices = @transform_2, window_bounds = array<i64: 1, 32>}, {pipeline_mode = #tpu.pipeline_mode<synchronous>, transform_indices = @transform_3, window_bounds = array<i64: 1, 32>}, {pipeline_mode = #tpu.pipeline_mode<synchronous>, transform_indices = @transform_4, window_bounds = array<i64: 1, 32>}, {transform_indices = @transform_5, window_bounds = array<i64: 128, 32>}, {transform_indices = @transform_6, window_bounds = array<i64: 1, 128>}, {transform_indices = @transform_7, window_bounds = array<i64: 8, 128>}]} {
    %c0_i32 = arith.constant 0 : i32
    %0 = arith.cmpi eq, %arg1, %c0_i32 : i32
    %1 = arith.extui %0 : i1 to i32
    %c0_i32_0 = arith.constant 0 : i32
    %2 = arith.cmpi ne, %1, %c0_i32_0 : i32
    scf.if %2 {
      %c0_8 = arith.constant 0 : index
      %c0_9 = arith.constant 0 : index
      %10 = vector.load %arg2[%c0_8, %c0_9] : memref<8x32xf32, #tpu.memory_space<vmem>>, vector<8x32xf32>
      %c0_10 = arith.constant 0 : index
      %c0_11 = arith.constant 0 : index
      %11 = vector.load %arg3[%c0_10, %c0_11] : memref<32x32xf32, #tpu.memory_space<vmem>>, vector<32x32xf32>
      %cst_12 = arith.constant dense<0.000000e+00> : vector<8x32xf32>
      %12 = tpu.matmul %10, %11, %cst_12 {dimension_numbers = #tpu.dot_dimension_numbers<[1], [1], [0], [0], [0, 0, 1, 0], [], []>} : vector<8x32xf32>, vector<32x32xf32>, vector<8x32xf32> -> vector<8x32xf32>
      %c0_13 = arith.constant 0 : index
      %c0_14 = arith.constant 0 : index
      %13 = vector.load %arg4[%c0_13, %c0_14] : memref<1x32xf32, #tpu.memory_space<vmem>>, vector<1x32xf32>
      %14 = vector.broadcast %13 : vector<1x32xf32> to vector<8x32xf32>
      %15 = arith.addf %12, %14 : vector<8x32xf32>
      %cst_15 = arith.constant 5.000000e-01 : f32
      %16 = vector.broadcast %cst_15 : f32 to vector<8x32xf32>
      %17 = arith.mulf %15, %16 : vector<8x32xf32>
      %cst_16 = arith.constant 0.707106769 : f32
      %18 = vector.broadcast %cst_16 : f32 to vector<8x32xf32>
      %19 = arith.mulf %15, %18 : vector<8x32xf32>
      %20 = math.erf %19 : vector<8x32xf32>
      %cst_17 = arith.constant 1.000000e+00 : f32
      %21 = vector.broadcast %cst_17 : f32 to vector<8x32xf32>
      %22 = arith.addf %21, %20 : vector<8x32xf32>
      %23 = arith.mulf %17, %22 : vector<8x32xf32>
      %cst_18 = arith.constant dense<0.000000e+00> : vector<8xf32>
      %24 = vector.multi_reduction <add>, %23, %cst_18 [1] : vector<8x32xf32> to vector<8xf32>
      %25 = vector.shape_cast %24 : vector<8xf32> to vector<8x1xf32>
      %cst_19 = arith.constant 3.200000e+01 : f32
      %26 = vector.broadcast %cst_19 : f32 to vector<8x1xf32>
      %27 = arith.divf %25, %26 : vector<8x1xf32>
      %28 = vector.broadcast %27 : vector<8x1xf32> to vector<8x32xf32>
      %29 = arith.subf %23, %28 : vector<8x32xf32>
      %30 = arith.mulf %29, %29 : vector<8x32xf32>
      %cst_20 = arith.constant dense<0.000000e+00> : vector<8xf32>
      %31 = vector.multi_reduction <add>, %30, %cst_20 [1] : vector<8x32xf32> to vector<8xf32>
      %32 = vector.shape_cast %31 : vector<8xf32> to vector<8x1xf32>
      %cst_21 = arith.constant 3.200000e+01 : f32
      %33 = vector.broadcast %cst_21 : f32 to vector<8x1xf32>
      %34 = arith.divf %32, %33 : vector<8x1xf32>
      %cst_22 = arith.constant 9.99999974E-6 : f32
      %35 = vector.broadcast %cst_22 : f32 to vector<8x1xf32>
      %36 = arith.addf %34, %35 : vector<8x1xf32>
      %37 = math.rsqrt %36 : vector<8x1xf32>
      %38 = vector.broadcast %37 : vector<8x1xf32> to vector<8x32xf32>
      %39 = arith.mulf %29, %38 : vector<8x32xf32>
      %c0_23 = arith.constant 0 : index
      %c0_24 = arith.constant 0 : index
      %40 = vector.load %arg5[%c0_23, %c0_24] : memref<1x32xf32, #tpu.memory_space<vmem>>, vector<1x32xf32>
      %41 = vector.broadcast %40 : vector<1x32xf32> to vector<8x32xf32>
      %42 = arith.mulf %39, %41 : vector<8x32xf32>
      %c0_25 = arith.constant 0 : index
      %c0_26 = arith.constant 0 : index
      %43 = vector.load %arg6[%c0_25, %c0_26] : memref<1x32xf32, #tpu.memory_space<vmem>>, vector<1x32xf32>
      %44 = vector.broadcast %43 : vector<1x32xf32> to vector<8x32xf32>
      %45 = arith.addf %42, %44 : vector<8x32xf32>
      %c0_27 = arith.constant 0 : index
      %c0_28 = arith.constant 0 : index
      %46 = vector.load %arg10[%c0_27, %c0_28] : memref<8x32xf32, #tpu.memory_space<vmem>>, vector<8x32xf32>
      tpu.vector_store %arg10[%c0_27, %c0_28], %45 {strides = array<i32>} : memref<8x32xf32, #tpu.memory_space<vmem>>, vector<8x32xf32>,
    } else {
    }
    %c0 = arith.constant 0 : index
    %c0_1 = arith.constant 0 : index
    %3 = vector.load %arg10[%c0, %c0_1] : memref<8x32xf32, #tpu.memory_space<vmem>>, vector<8x32xf32>
    %c0_2 = arith.constant 0 : index
    %c0_3 = arith.constant 0 : index
    %4 = vector.load %arg7[%c0_2, %c0_3] : memref<128x32xf32, #tpu.memory_space<vmem>>, vector<128x32xf32>
    %cst = arith.constant dense<0.000000e+00> : vector<8x128xf32>
    %5 = tpu.matmul %3, %4, %cst {dimension_numbers = #tpu.dot_dimension_numbers<[1], [1], [0], [0], [0, 0, 1, 0], [], []>} : vector<8x32xf32>, vector<128x32xf32>, vector<8x128xf32> -> vector<8x128xf32>
    %c0_4 = arith.constant 0 : index
    %c0_5 = arith.constant 0 : index
    %6 = vector.load %arg8[%c0_4, %c0_5] : memref<1x128xf32, #tpu.memory_space<vmem>>, vector<1x128xf32>
    %7 = vector.broadcast %6 : vector<1x128xf32> to vector<8x128xf32>
    %8 = arith.addf %5, %7 : vector<8x128xf32>
    %c0_6 = arith.constant 0 : index
    %c0_7 = arith.constant 0 : index
    %9 = vector.load %arg9[%c0_6, %c0_7] : memref<8x128xf32, #tpu.memory_space<vmem>>, vector<8x128xf32>
    tpu.vector_store %arg9[%c0_6, %c0_7], %8 {strides = array<i32>} : memref<8x128xf32, #tpu.memory_space<vmem>>, vector<8x128xf32>,
    return
  }
  func.func @transform_0(%arg0: i32, %arg1: i32) -> (i32, i32) {
    %c0_i32 = arith.constant 0 : i32
    %c0_i32_0 = arith.constant 0 : i32
    return %arg0, %c0_i32 : i32, i32
  }
  func.func @transform_1(%arg0: i32, %arg1: i32) -> (i32, i32) {
    %c0_i32 = arith.constant 0 : i32
    %c0_i32_0 = arith.constant 0 : i32
    %c0_i32_1 = arith.constant 0 : i32
    return %c0_i32, %c0_i32_0 : i32, i32
  }
  func.func @transform_2(%arg0: i32, %arg1: i32) -> (i32, i32) {
    %c0_i32 = arith.constant 0 : i32
    %c0_i32_0 = arith.constant 0 : i32
    %c0_i32_1 = arith.constant 0 : i32
    return %c0_i32, %c0_i32_0 : i32, i32
  }
  func.func @transform_3(%arg0: i32, %arg1: i32) -> (i32, i32) {
    %c0_i32 = arith.constant 0 : i32
    %c0_i32_0 = arith.constant 0 : i32
    %c0_i32_1 = arith.constant 0 : i32
    return %c0_i32, %c0_i32_0 : i32, i32
  }
  func.func @transform_4(%arg0: i32, %arg1: i32) -> (i32, i32) {
    %c0_i32 = arith.constant 0 : i32
    %c0_i32_0 = arith.constant 0 : i32
    %c0_i32_1 = arith.constant 0 : i32
    return %c0_i32, %c0_i32_0 : i32, i32
  }
  func.func @transform_5(%arg0: i32, %arg1: i32) -> (i32, i32) {
    %c0_i32 = arith.constant 0 : i32
    %c0_i32_0 = arith.constant 0 : i32
    return %arg1, %c0_i32 : i32, i32
  }
  func.func @transform_6(%arg0: i32, %arg1: i32) -> (i32, i32) {
    %c0_i32 = arith.constant 0 : i32
    %c0_i32_0 = arith.constant 0 : i32
    return %c0_i32, %arg1 : i32, i32
  }
  func.func @transform_7(%arg0: i32, %arg1: i32) -> (i32, i32) {
    %c0_i32 = arith.constant 0 : i32
    return %arg0, %arg1 : i32, i32
  }
}

module attributes {stable_mosaic.version = 11 : i64} {
  func.func @_lm_head_kernel(%arg0: i32, %arg1: i32, %arg2: memref<8x32xf32, #tpu.memory_space<vmem>>, %arg3: memref<32x32xf32, #tpu.memory_space<vmem>>, %arg4: memref<1x32xf32, #tpu.memory_space<vmem>>, %arg5: memref<1x32xf32, #tpu.memory_space<vmem>>, %arg6: memref<1x32xf32, #tpu.memory_space<vmem>>, %arg7: memref<128x32xf32, #tpu.memory_space<vmem>>, %arg8: memref<1x128xf32, #tpu.memory_space<vmem>>, %arg9: memref<8x128xf32, #tpu.memory_space<vmem>>, %arg10: memref<8x32xf32, #tpu.memory_space<vmem>>) attributes {dimension_semantics = [#tpu.dimension_semantics<parallel>, #tpu.dimension_semantics<arbitrary>], iteration_bounds = array<i64: 3, 2>, scalar_prefetch = 0 : i64, scratch_operands = 1 : i64, tpu.core_type = #tpu.core_type<tc>, window_params = [{transform_indices = @transform_0, window_bounds = array<i64: 8, 32>}, {pipeline_mode = #tpu.pipeline_mode<synchronous>, transform_indices = @transform_1, window_bounds = array<i64: 32, 32>}, {pipeline_mode = #tpu.pipeline_mode<synchronous>, transform_indices = @transform_2, window_bounds = array<i64: 1, 32>}, {pipeline_mode = #tpu.pipeline_mode<synchronous>, transform_indices = @transform_3, window_bounds = array<i64: 1, 32>}, {pipeline_mode = #tpu.pipeline_mode<synchronous>, transform_indices = @transform_4, window_bounds = array<i64: 1, 32>}, {transform_indices = @transform_5, window_bounds = array<i64: 128, 32>}, {transform_indices = @transform_6, window_bounds = array<i64: 1, 128>}, {transform_indices = @transform_7, window_bounds = array<i64: 8, 128>}]} {
    %c0_i32 = arith.constant 0 : i32
    %0 = arith.cmpi eq, %arg1, %c0_i32 : i32
    %1 = arith.extui %0 : i1 to i32
    %c0_i32_0 = arith.constant 0 : i32
    %2 = arith.cmpi ne, %1, %c0_i32_0 : i32
    scf.if %2 {
      %c0_8 = arith.constant 0 : index
      %c0_9 = arith.constant 0 : index
      %10 = vector.load %arg2[%c0_8, %c0_9] : memref<8x32xf32, #tpu.memory_space<vmem>>, vector<8x32xf32>
      %c0_10 = arith.constant 0 : index
      %c0_11 = arith.constant 0 : index
      %11 = vector.load %arg3[%c0_10, %c0_11] : memref<32x32xf32, #tpu.memory_space<vmem>>, vector<32x32xf32>
      %cst_12 = arith.constant dense<0.000000e+00> : vector<8x32xf32>
      %12 = tpu.matmul %10, %11, %cst_12 {dimension_numbers = #tpu.dot_dimension_numbers<[1], [1], [0], [0], [0, 0, 1, 0], [], []>} : vector<8x32xf32>, vector<32x32xf32>, vector<8x32xf32> -> vector<8x32xf32>
      %c0_13 = arith.constant 0 : index
      %c0_14 = arith.constant 0 : index
      %13 = vector.load %arg4[%c0_13, %c0_14] : memref<1x32xf32, #tpu.memory_space<vmem>>, vector<1x32xf32>
      %14 = vector.broadcast %13 : vector<1x32xf32> to vector<8x32xf32>
      %15 = arith.addf %12, %14 : vector<8x32xf32>
      %cst_15 = arith.constant 5.000000e-01 : f32
      %16 = vector.broadcast %cst_15 : f32 to vector<8x32xf32>
      %17 = arith.mulf %15, %16 : vector<8x32xf32>
      %cst_16 = arith.constant 0.707106769 : f32
      %18 = vector.broadcast %cst_16 : f32 to vector<8x32xf32>
      %19 = arith.mulf %15, %18 : vector<8x32xf32>
      %20 = math.erf %19 : vector<8x32xf32>
      %cst_17 = arith.constant 1.000000e+00 : f32
      %21 = vector.broadcast %cst_17 : f32 to vector<8x32xf32>
      %22 = arith.addf %21, %20 : vector<8x32xf32>
      %23 = arith.mulf %17, %22 : vector<8x32xf32>
      %cst_18 = arith.constant dense<0.000000e+00> : vector<8xf32>
      %24 = vector.multi_reduction <add>, %23, %cst_18 [1] : vector<8x32xf32> to vector<8xf32>
      %25 = vector.shape_cast %24 : vector<8xf32> to vector<8x1xf32>
      %cst_19 = arith.constant 3.200000e+01 : f32
      %26 = vector.broadcast %cst_19 : f32 to vector<8x1xf32>
      %27 = arith.divf %25, %26 : vector<8x1xf32>
      %28 = vector.broadcast %27 : vector<8x1xf32> to vector<8x32xf32>
      %29 = arith.subf %23, %28 : vector<8x32xf32>
      %30 = arith.mulf %29, %29 : vector<8x32xf32>
      %cst_20 = arith.constant dense<0.000000e+00> : vector<8xf32>
      %31 = vector.multi_reduction <add>, %30, %cst_20 [1] : vector<8x32xf32> to vector<8xf32>
      %32 = vector.shape_cast %31 : vector<8xf32> to vector<8x1xf32>
      %cst_21 = arith.constant 3.200000e+01 : f32
      %33 = vector.broadcast %cst_21 : f32 to vector<8x1xf32>
      %34 = arith.divf %32, %33 : vector<8x1xf32>
      %cst_22 = arith.constant 9.99999974E-6 : f32
      %35 = vector.broadcast %cst_22 : f32 to vector<8x1xf32>
      %36 = arith.addf %34, %35 : vector<8x1xf32>
      %37 = math.rsqrt %36 : vector<8x1xf32>
      %38 = vector.broadcast %37 : vector<8x1xf32> to vector<8x32xf32>
      %39 = arith.mulf %29, %38 : vector<8x32xf32>
      %c0_23 = arith.constant 0 : index
      %c0_24 = arith.constant 0 : index
      %40 = vector.load %arg5[%c0_23, %c0_24] : memref<1x32xf32, #tpu.memory_space<vmem>>, vector<1x32xf32>
      %41 = vector.broadcast %40 : vector<1x32xf32> to vector<8x32xf32>
      %42 = arith.mulf %39, %41 : vector<8x32xf32>
      %c0_25 = arith.constant 0 : index
      %c0_26 = arith.constant 0 : index
      %43 = vector.load %arg6[%c0_25, %c0_26] : memref<1x32xf32, #tpu.memory_space<vmem>>, vector<1x32xf32>
      %44 = vector.broadcast %43 : vector<1x32xf32> to vector<8x32xf32>
      %45 = arith.addf %42, %44 : vector<8x32xf32>
      %c0_27 = arith.constant 0 : index
      %c0_28 = arith.constant 0 : index
      %46 = vector.load %arg10[%c0_27, %c0_28] : memref<8x32xf32, #tpu.memory_space<vmem>>, vector<8x32xf32>
      tpu.vector_store %arg10[%c0_27, %c0_28], %45 {strides = array<i32>} : memref<8x32xf32, #tpu.memory_space<vmem>>, vector<8x32xf32>,
    } else {
    }
    %c0 = arith.constant 0 : index
    %c0_1 = arith.constant 0 : index
    %3 = vector.load %arg10[%c0, %c0_1] : memref<8x32xf32, #tpu.memory_space<vmem>>, vector<8x32xf32>
    %c0_2 = arith.constant 0 : index
    %c0_3 = arith.constant 0 : index
    %4 = vector.load %arg7[%c0_2, %c0_3] : memref<128x32xf32, #tpu.memory_space<vmem>>, vector<128x32xf32>
    %cst = arith.constant dense<0.000000e+00> : vector<8x128xf32>
    %5 = tpu.matmul %3, %4, %cst {dimension_numbers = #tpu.dot_dimension_numbers<[1], [1], [0], [0], [0, 0, 1, 0], [], []>} : vector<8x32xf32>, vector<128x32xf32>, vector<8x128xf32> -> vector<8x128xf32>
    %c0_4 = arith.constant 0 : index
    %c0_5 = arith.constant 0 : index
    %6 = vector.load %arg8[%c0_4, %c0_5] : memref<1x128xf32, #tpu.memory_space<vmem>>, vector<1x128xf32>
    %7 = vector.broadcast %6 : vector<1x128xf32> to vector<8x128xf32>
    %8 = arith.addf %5, %7 : vector<8x128xf32>
    %c0_6 = arith.constant 0 : index
    %c0_7 = arith.constant 0 : index
    %9 = vector.load %arg9[%c0_6, %c0_7] : memref<8x128xf32, #tpu.memory_space<vmem>>, vector<8x128xf32>
    tpu.vector_store %arg9[%c0_6, %c0_7], %8 {strides = array<i32>} : memref<8x128xf32, #tpu.memory_space<vmem>>, vector<8x128xf32>,
    return
  }
  func.func @transform_0(%arg0: i32, %arg1: i32) -> (i32, i32) {
    %c0_i32 = arith.constant 0 : i32
    %c0_i32_0 = arith.constant 0 : i32
    return %arg0, %c0_i32 : i32, i32
  }
  func.func @transform_1(%arg0: i32, %arg1: i32) -> (i32, i32) {
    %c0_i32 = arith.constant 0 : i32
    %c0_i32_0 = arith.constant 0 : i32
    %c0_i32_1 = arith.constant 0 : i32
    return %c0_i32, %c0_i32_0 : i32, i32
  }
  func.func @transform_2(%arg0: i32, %arg1: i32) -> (i32, i32) {
    %c0_i32 = arith.constant 0 : i32
    %c0_i32_0 = arith.constant 0 : i32
    %c0_i32_1 = arith.constant 0 : i32
    return %c0_i32, %c0_i32_0 : i32, i32
  }
  func.func @transform_3(%arg0: i32, %arg1: i32) -> (i32, i32) {
    %c0_i32 = arith.constant 0 : i32
    %c0_i32_0 = arith.constant 0 : i32
    %c0_i32_1 = arith.constant 0 : i32
    return %c0_i32, %c0_i32_0 : i32, i32
  }
  func.func @transform_4(%arg0: i32, %arg1: i32) -> (i32, i32) {
    %c0_i32 = arith.constant 0 : i32
    %c0_i32_0 = arith.constant 0 : i32
    %c0_i32_1 = arith.constant 0 : i32
    return %c0_i32, %c0_i32_0 : i32, i32
  }
  func.func @transform_5(%arg0: i32, %arg1: i32) -> (i32, i32) {
    %c0_i32 = arith.constant 0 : i32
    %c0_i32_0 = arith.constant 0 : i32
    return %arg1, %c0_i32 : i32, i32
  }
  func.func @transform_6(%arg0: i32, %arg1: i32) -> (i32, i32) {
    %c0_i32 = arith.constant 0 : i32
    %c0_i32_0 = arith.constant 0 : i32
    return %c0_i32, %arg1 : i32, i32
  }
  func.func @transform_7(%arg0: i32, %arg1: i32) -> (i32, i32) {
    %c0_i32 = arith.constant 0 : i32
    return %arg0, %arg1 : i32, i32
  }
}

</mosaic_0001>

<bundles_post_ra>
// kernel: tpu_custom_call.1
= control target key start
LH: loop header
LB: loop body
LE: loop exit
PB: predicated region body
PF: predicated region fallthrough
CT: control target
= control target key end

     0   :  { %12 = vsyncpa [#allocation4], 0  ;;  %s1132_s0 = inlined_call_operand.vmem [shape: f32[18,32], index: 0, kind: input, shape index: {}]   ;;  %s1133_s1 = inlined_call_operand.vmem [shape: f32[32,32], index: 1, kind: input, shape index: {}]   ;;  %s1134_s2 = inlined_call_operand.vmem [shape: f32[1,32], index: 2, kind: input, shape index: {}]   ;;  %s1135_s3 = inlined_call_operand.vmem [shape: f32[1,32], index: 3, kind: input, shape index: {}]   ;;  %s1136_s4 = inlined_call_operand.vmem [shape: f32[1,32], index: 4, kind: input, shape index: {}]   ;;  %s1137_s5 = inlined_call_operand.vmem [shape: f32[250,32], index: 5, kind: input, shape index: {}]   ;;  %s1138_s6 = inlined_call_operand.vmem [shape: f32[1,250], index: 6, kind: input, shape index: {}]   ;;  %s1139_s7 = inlined_call_operand.hbm [shape: f32[18,250], index: 7, kind: output, shape index: {}]  }
   0x1   :  { %14 = vsyncpa [#allocation4 + $0x1], 0  ;;  %s919_s24 = smov 0   ;;  %s921_s25 = smov 0  }
   0x2   :  { %s923_s26 = smov 0   ;;  %s925_s27 = smov 0  }
   0x3   :  { %s927_s28 = smov 0   ;;  %s929_s29 = smov 0  }
   0x4   :  { %s931_s30 = smov 0   ;;  %s933_s8 = smov 0  }
   0x5 LB: > { %1146 = sst [smem:[#allocation6_spill]] %s856_s26  ;;  %s662_s9 = sadd.s32 4294967295, %s876_s8   ;;  %s876_s8 = sphi %s933_s8, %s20_s8   ;;  %s872_s30 = sphi %s931_s30, %s1160_s30   ;;  %s868_s29 = sphi %s929_s29, %s1159_s29   ;;  %s864_s28 = sphi %s927_s28, %s1158_s28   ;;  %s860_s27 = sphi %s925_s27, %s1157_s27   ;;  %s856_s26 = sphi %s923_s26, %s1156_s26   ;;  %s852_s25 = sphi %s921_s25, %s1162_s25   ;;  %s848_s24 = sphi %s919_s24, %s1161_s24  }
   0x6   : > { %1147 = sst [smem:[#allocation7_spill]] %s868_s29  ;;  %s663_s10 = sadd.s32 4294967294, %s876_s8  }
   0x7   : > { %1148 = sst [smem:[#allocation8_spill]] %s872_s30  ;;  %s29_s11 = sadd.s32 1, %s868_s29 }
   0x8   : > { %p30_p0 = scmp.ge.s32.totalorder %s29_s11, 2  ;;  %s32_s12 = sadd.s32 1, %s872_s30 }
   0x9   : > { %p213_p1 = scmp.ne.s32.totalorder %s856_s26, %s852_s25  ;;  %p214_p2 = scmp.eq.s32.totalorder %s662_s9, 5 }
   0xa   : > { %s1164_s11 = smov (%p30_p0, %s29_s11), 0  ;;  %s1166_s12 = smov (!%p30_p0, %s32_s12), %s872_s30 }
   0xb   : > { %1149 = sst [smem:[#allocation9_spill]] %s1164_s11  ;;  %s199_s13 = ssub.s32 %s868_s29, %s1164_s11 }
   0xc   : > { %p970_p3 = por %p214_p2, %p213_p1  ;;  %p34_p4 = scmp.ge.s32.totalorder %s1166_s12, 3 }
   0xd   : > { %p219_p5 = scmp.ne.s32.totalorder %s852_s25, %s848_s24  ;;  %p220_p6 = scmp.eq.s32.totalorder %s663_s10, 5 }
   0xe   : > { %p666_p7 = scmp.ge.s32.totalorder %s876_s8, 1  ;;  %s1168_s12 = smov (%p34_p4, %s1166_s12), 0 }
   0xf   : > { %1151 = sst [smem:[#allocation10_spill]] %s1168_s12  ;;  %p979_p8 = por %p220_p6, %p219_p5 }
  0x10   : > { %p272_p9 = scmp.lt.s32.totalorder %s876_s8, 7  ;;  %s198_s16 = ssub.s32 %s872_s30, %s1168_s12 }
  0x11   : > { %s203_s17 = sadd.s32 1, %s856_s26  ;;  %s200_s18 = sor.u32 %s199_s13, %s198_s16 }
  0x12   : > { %p273_p10 = pnand %p666_p7, %p272_p9  ;;  %p201_p11 = scmp.eq.s32.totalorder %s200_s18, 0 }
  0x13   : > { %s1143_s20 = sand.u32 (!%p273_p10), 1, %s852_s25   ;;  %p311_p12 = scmp.lt.s32.totalorder (!%p273_p10), %s864_s28, 2 }
  0x14   : > { %s988_s19 = scalar_select %p201_p11, %s856_s26, %s203_s17  }
  0x15   : > { %276 = sbr.rel (%p273_p10) target bundleno = 695 (0x2b7), region = 48  ;;  %s994_s21 = sshll.u32 (!%p273_p10), %s1143_s20, 3 }
  0x16   : > { %1153 = sst [smem:[#allocation11_spill]] %s988_s19  ;;  %s669_s22 = sshll.u32 (!%p273_p10), %s860_s27, 4 }
  0x17   : > { %p316_p13 = scmp.lt.s32.totalorder (!%p273_p10), %s669_s22, 31  ;;  %p321_p0 = scmp.lt.s32.totalorder (!%p273_p10), %s860_s27, 1 }
  0x18   : > { %s310_s26 = scalar_lea.vmem (!%p273_p10), [#allocation3], %s994_s21  ;;  %p671_p1 = scmp.ne.s32.totalorder (!%p273_p10), %s860_s27, 0 }
  0x1a   : > { %s312_s23 = scalar_select %p311_p12, %s864_s28, 2 }
  0x1b   : > { %s1170_s22 = smov (!%p316_p13, %s669_s22), 31 }
  0x1c   : > { %s668_s9 = sshll.u32 %s312_s23, 3  ;;  %s670_s17 = sshll.u32 %s1170_s22, 3 }
  0x1d   : > { %s314_s16 = scalar_lea.vmem %s1132_s0, %s668_s9  ;;  %s1005_s11 = scalar_lea.vmem %s1137_s5, %s670_s17 }
  0x1e   : > { %s1008_s30 = scalar_select %p321_p0, %s860_s27, 1 }
  0x1f   : > { %327 = sbr.rel (%p671_p1) target bundleno = 500 (0x1f4), region = 52 }
  0x20   : > { %s323_s19 = scalar_lea.vmem %s1138_s6, %s1008_s30 }
  0x24   : > { %v332_v0 = vld [vmem:[%s1133_s1 + $0x18] sm:$0xff]  ;;  %vm337_vm0 = vcmask 261120   ;;  %v331_v1 = vld [vmem:[%s1133_s1 + $0x10] sm:$0xff]  ;;  %v330_v2 = vld [vmem:[%s1133_s1 + $0x8] sm:$0xff]  ;;  %v878_v48 = vmov 32.0  }
  0x25   : > { %672 = vmatpush.xpose.msk.msra.mxu0 %vm337_vm0, %v332_v0  ;;  %v329_v3 = vld [vmem:[%s1133_s1] sm:$0xff] }
  0x26   : > { %v328_v4 = vld [vmem:[%s314_s16] sm:$0xff] }
  0x27   : > { %v772_v5 = vld [vmem:[%s1134_s2] ss:$0 sm:$0xff] }
  0x29   : > { %673 = vmatpush.xpose.msk.msra.mxu0 %vm337_vm0, %v331_v1 }
  0x2d   : > { %674 = vmatpush.xpose.msk.msra.mxu0 %vm337_vm0, %v330_v2 }
  0x31   : > { %675 = vmatpush.xpose.msk.msra.mxu0 %vm337_vm0, %v329_v3 }
  0x34   : > { %676 = vmatmul.msk.f32.vlgmr.msra.gmra.mxu0 %vm337_vm0, %v328_v4 }
  0xb1   : > { %v370_v6 = vpop.f32.mrf.mxu0 }
  0xb2   : > { %v371_v7 = vadd.f32 %v772_v5, %v370_v6  ;;  %v773_v5 = vld [vmem:[%s1135_s3] ss:$0 sm:$0xff] }
  0xb4   : > { %v374_v8 = vmul.f32 0.70710677, %v371_v7  ;;  %v373_v44 = vmul.f32 0.5, %v371_v7  ;;  %v774_v7 = vld [vmem:[%s1136_s4] ss:$0 sm:$0xff] }
  0xb6   : > { %v375_v9 = vmul.f32 %v374_v8, %v374_v8 }
  0xb8   : > { %v376_v10 = vmin.f32 %v375_v9, 16.0 }
  0xba   : > { %v377_v11 = vmul.f32 2.1237322e-06, %v376_v10  ;;  %v388_v12 = vmul.f32 3.8918573e-05, %v376_v10 }
  0xbc   : > { %v378_v13 = vadd.f32 0.00028619796, %v377_v11  ;;  %v389_v14 = vadd.f32 0.001143296, %v388_v12 }
  0xbe   : > { %v379_v15 = vmul.f32 %v378_v13, %v376_v10  ;;  %v390_v16 = vmul.f32 %v389_v14, %v376_v10 }
  0xc0   : > { %v391_v17 = vadd.f32 0.014752088, %v390_v16  ;;  %v380_v18 = vadd.f32 0.0036580483, %v379_v15 }
  0xc2   : > { %v392_v19 = vmul.f32 %v391_v17, %v376_v10  ;;  %v381_v21 = vmul.f32 %v380_v18, %v376_v10 }
  0xc4   : > { %v393_v20 = vadd.f32 0.112945676, %v392_v19  ;;  %v382_v24 = vadd.f32 0.05243302, %v381_v21 }
  0xc6   : > { %v394_v22 = vmul.f32 %v393_v20, %v376_v10  ;;  %v383_v27 = vmul.f32 %v382_v24, %v376_v10 }
  0xc8   : > { %v395_v23 = vadd.f32 0.4994258, %v394_v22  ;;  %v384_v28 = vadd.f32 0.18741608, %v383_v27 }
  0xca   : > { %v396_v25 = vmul.f32 %v395_v23, %v376_v10  ;;  %v385_v30 = vmul.f32 %v384_v28, %v376_v10 }
  0xcc   : > { %v397_v26 = vadd.f32 1.0, %v396_v25  ;;  %v386_v34 = vadd.f32 1.1283791, %v385_v30 }
  0xce   : > { %775 = vrcp.f32 %v397_v26  ;;  %v409_v33 = vand.u32 2147483648, %v397_v26  ;;  %v407_v36 = vand.u32 2147483647, %v397_v26  ;;  %vm403_vm2 = vweird.f32 %v397_v26 }
  0xcf   : > { %v387_v39 = vmul.f32 %v386_v34, %v374_v8  ;;  %777 = vrcp.f32 %v878_v48 }
  0xd0   : > { %v410_v38 = vor.u32 1.1754944e-38, %v409_v33  ;;  %vm408_vm4 = vcmp.eq.f32.partialorder %v407_v36, 8.507059e+37 }
  0xd4   : > { %v776_v29 = vpop.eup %775 }
  0xd5   : > { %v399_v31 = vmul.f32 %v776_v29, %v397_v26  ;;  %vm404_vm1 = vweird.f32 %v776_v29  ;;  %v778_v49 = vpop.eup %777 }
  0xd6   : > { %vm405_vm3 = vmor %vm403_vm2, %vm404_vm1  ;;  %v421_v50 = vmul.f32 32.0, %v778_v49  ;;  %vm425_vm5 = vweird.f32 %v778_v49 }
  0xd7   : > { %v400_v32 = vsub.f32 1.0, %v399_v31 }
  0xd8   : > { %v422_v51 = vsub.f32 1.0, %v421_v50 }
  0xd9   : > { %v401_v35 = vmul.f32 %v776_v29, %v400_v32 }
  0xda   : > { %v423_v52 = vmul.f32 %v778_v49, %v422_v51 }
  0xdb   : > { %v402_v37 = vadd.f32 %v776_v29, %v401_v35 }
  0xdc   : > { %v424_v53 = vadd.f32 %v778_v49, %v423_v52 }
  0xdd   : > { %v406_v40 = vsel %vm405_vm3, %v776_v29, %v402_v37 }
  0xde   : > { %v411_v41 = vsel %vm408_vm4, %v410_v38, %v406_v40  ;;  %v426_v54 = vsel %vm425_vm5, %v778_v49, %v424_v53 }
  0xdf   : > { %v412_v42 = vmul.f32 %v411_v41, %v387_v39 }
  0xe1   : > { %v677_v43 = vclamps-f32 %v412_v42, 1.0 }
  0xe3   : > { %v415_v45 = vadd.f32 1.0, %v677_v43 }
  0xe5   : > { %v416_v46 = vmul.f32 %v415_v45, %v373_v44 }
  0xe7   : > { %v417_v47 = vsel %vm337_vm0, %v416_v46, 0.0 }
  0xe8   : > { %418 = vadd.xlane.f32.xlu0 %v417_v47 }
 0x15b   : > { %v419_v55 = vpop.xlane.xlu0 %418 }
 0x15c   : > { %v427_v56 = vmul.f32 %v426_v54, %v419_v55 }
 0x15e   : > { %v428_v57 = vsub.f32 %v416_v46, %v427_v56 }
 0x160   : > { %v429_v58 = vmul.f32 %v428_v57, %v428_v57 }
 0x162   : > { %v430_v59 = vsel %vm337_vm0, %v429_v58, 0.0 }
 0x163   : > { %431 = vadd.xlane.f32.xlu0 %v430_v59 }
 0x1d6   : > { %v432_v60 = vpop.xlane.xlu0 %431 }
 0x1d7   : > { %v433_v61 = vmul.f32 %v432_v60, %v426_v54 }
 0x1d9   : > { %v434_v62 = vadd.f32 1e-05, %v433_v61 }
 0x1db   : > { %779 = vrsqrt.f32 %v434_v62  ;;  %vm441_vm7 = vweird.f32 %v434_v62 }
 0x1e1   : > { %v780_v63 = vpop.eup %779 }
 0x1e2   : > { %v436_v0 = vmul.f32 %v780_v63, %v434_v62  ;;  %vm442_vm6 = vweird.f32 %v780_v63 }
 0x1e3   : > { %vm443_vm8 = vmor %vm441_vm7, %vm442_vm6 }
 0x1e4   : > { %v437_v1 = vmul.f32 %v780_v63, %v436_v0 }
 0x1e6   : > { %v438_v2 = vmul.f32 0.5, %v437_v1 }
 0x1e8   : > { %v439_v3 = vsub.f32 1.5, %v438_v2 }
 0x1ea   : > { %v440_v4 = vmul.f32 %v780_v63, %v439_v3 }
 0x1ec   : > { %v444_v6 = vsel %vm443_vm8, %v780_v63, %v440_v4 }
 0x1ed   : > { %v445_v8 = vmul.f32 %v444_v6, %v428_v57 }
 0x1ef   : > { %v450_v9 = vmul.f32 %v773_v5, %v445_v8 }
 0x1f1   : > { %v455_v10 = vadd.f32 %v774_v7, %v450_v9 }
 0x1f3   : > { %456 = vst.msk [vmem:[#allocation2] sm:$0xff] %vm337_vm0, %v455_v10 }
 0x1f4 PF: > { %v473_v11 = vld [vmem:[%s1005_s11 + $0x78] sm:$0xff]  ;;  %vm478_vm9 = vcmask 261120   ;;  %v472_v12 = vld [vmem:[%s1005_s11 + $0x70] sm:$0xff]  ;;  %v471_v13 = vld [vmem:[%s1005_s11 + $0x68] sm:$0xff]  ;;  %s696_s22 = sshll.u32 %s864_s28, 1 }
 0x1f5   : > { %678 = vmatpush.xpose.msk.msra.mxu0 %vm478_vm9, %v473_v11  ;;  %v470_v14 = vld [vmem:[%s1005_s11 + $0x60] sm:$0xff]  ;;  %v469_v15 = vld [vmem:[%s1005_s11 + $0x58] sm:$0xff]  ;;  %v468_v16 = vld [vmem:[%s1005_s11 + $0x50] sm:$0xff]  ;;  %s562_s9 = sadd.s32 %s860_s27, %s696_s22  ;;  %s1154_s27 = sand.u32 1, %s852_s25  }
 0x1f6   : > { %v467_v17 = vld [vmem:[%s1005_s11 + $0x48] sm:$0xff]  ;;  %v466_v18 = vld [vmem:[%s1005_s11 + $0x40] sm:$0xff]  ;;  %v465_v19 = vld [vmem:[%s1005_s11 + $0x38] sm:$0xff]  ;;  %s697_s29 = sshll.u32 %s562_s9, 3  ;;  %s552_s28 = scalar_lea.sflag [#allocation4], %s1154_s27 }
 0x1f7   : > { %v464_v20 = vld [vmem:[%s1005_s11 + $0x30] sm:$0xff]  ;;  %v463_v21 = vld [vmem:[%s1005_s11 + $0x28] sm:$0xff]  ;;  %v462_v22 = vld [vmem:[%s1005_s11 + $0x20] sm:$0xff]  ;;  %s564_s17 = scalar_lea.hbm %s1139_s7, %s697_s29  ;;  %s802_s22 = scalar_lea.hbm %s1139_s7, 48 }
 0x1f8   : > { %v461_v23 = vld [vmem:[%s1005_s11 + $0x18] sm:$0xff]  ;;  %v460_v24 = vld [vmem:[%s1005_s11 + $0x10] sm:$0xff]  ;;  %v459_v25 = vld [vmem:[%s1005_s11 + $0x8] sm:$0xff]  ;;  %s568_s23 = sshll.u32 %s564_s17, 4  ;;  %s569_s23 = int_to_ptr.hbm [resolvable:$true] %s568_s23 }
 0x1f9   : > { %679 = vmatpush.xpose.msk.msra.mxu0 %vm478_vm9, %v472_v12  ;;  %v458_v26 = vld [vmem:[%s1005_s11] sm:$0xff]  ;;  %s566_s11 = sshll.u32 %s310_s26, 4  ;;  %s796_s10 = sshra.s32 %s569_s23, 4  ;;  %s567_s11 = int_to_ptr.vmem [resolvable:$true] %s566_s11  ;;  %s797_s10 = int_to_ptr.hbm [resolvable:$true] %s796_s10 }
 0x1fa   : > { %v457_v27 = vld [vmem:[#allocation2] sm:$0xff]  ;;  %s798_s12 = scalar_lea.hbm %s797_s10, 8  ;;  %p803_p6 = scmp.lt.s32.totalorder %s797_s10, %s1139_s7 }
 0x1fb   : > { %v781_v28 = vld [vmem:[%s323_s19] ss:$0 sm:$0xff]  ;;  %p799_p2 = scmp.ne.s32.totalorder %s797_s10, %s798_s12  ;;  %p804_p7 = scmp.lt.s32.totalorder %s802_s22, %s798_s12 }
 0x1fd   : > { %680 = vmatpush.xpose.msk.msra.mxu0 %vm478_vm9, %v471_v13  ;;  %p800_p4 = pnand %p799_p2, %p970_p3  ;;  %p805_p9 = por %p804_p7, %p803_p6 }
 0x1ff   : > { %p801_p5 = pneg %p800_p4 }
 0x201   : > { %681 = vmatpush.xpose.msk.msra.mxu0 %vm478_vm9, %v470_v14  ;;  %p806_p10 = pnand %p805_p9, %p801_p5 }
 0x205   : > { %682 = vmatpush.xpose.msk.msra.mxu0 %vm478_vm9, %v469_v15 }
 0x209   : > { %683 = vmatpush.xpose.msk.msra.mxu0 %vm478_vm9, %v468_v16 }
 0x20d   : > { %684 = vmatpush.xpose.msk.msra.mxu0 %vm478_vm9, %v467_v17 }
 0x211   : > { %685 = vmatpush.xpose.msk.msra.mxu0 %vm478_vm9, %v466_v18 }
 0x215   : > { %686 = vmatpush.xpose.msk.msra.mxu0 %vm478_vm9, %v465_v19 }
 0x219   : > { %687 = vmatpush.xpose.msk.msra.mxu0 %vm478_vm9, %v464_v20 }
 0x21d   : > { %688 = vmatpush.xpose.msk.msra.mxu0 %vm478_vm9, %v463_v21 }
 0x221   : > { %689 = vmatpush.xpose.msk.msra.mxu0 %vm478_vm9, %v462_v22 }
 0x225   : > { %690 = vmatpush.xpose.msk.msra.mxu0 %vm478_vm9, %v461_v23 }
 0x229   : > { %691 = vmatpush.xpose.msk.msra.mxu0 %vm478_vm9, %v460_v24 }
 0x22d   : > { %692 = vmatpush.xpose.msk.msra.mxu0 %vm478_vm9, %v459_v25 }
 0x231   : > { %693 = vmatpush.xpose.msk.msra.mxu0 %vm478_vm9, %v458_v26 }
 0x234   : > { %694 = vmatmul.msk.f32.vlgmr.msra.gmra.mxu0 %vm478_vm9, %v457_v27 }
 0x2b1   : > { %v547_v29 = vpop.f32.mrf.mxu0 }
 0x2b2   : > { %v548_v30 = vadd.f32 %v781_v28, %v547_v29 }
 0x2b4   : > { %550 = vst [vmem:[%s310_s26] sm:$0xff] %v548_v30 }
 0x2b5   : > { %809 = shalt.err (!%p806_p10)
}
 0x2b6   : > { %700 = dma.vmem_to_hbm [thread:$0]  (%p970_p3), %s567_s11, 128, %s569_s23, %s552_s28  }
 0x2b7 PF: > { %p706_p11 = scmp.ge.s32.totalorder %s876_s8, 2  ;;  %s580_s26 = sand.u32 1, %s848_s24  }
 0x2b8   : > { %s581_s21 = scalar_lea.sflag [#allocation4], %s580_s26 }
 0x2b9   : > { %p703_p12 = pnand %p706_p11, %p979_p8 }
 0x2bb   : > { %p704_p13 = pneg %p703_p12 }
 0x2bd   : > { %843 = dma.done.wait (%p704_p13), %s581_s21, 128  }
 0x2be   : > { %845 = vsyncadd (%p704_p13), %s581_s21, 4294967168  ;;  %s20_s8 = sadd.s32 1, %s876_s8   ;;  %s1155_s20 = sld [smem:[#allocation6_spill]] }
 0x2bf   : > { %p17_p0 = scmp.ge.s32.totalorder %s20_s8, 8   ;;  %s1156_s26 = sld [smem:[#allocation11_spill]] }
 0x2c0   : > { %s1157_s27 = sld [smem:[#allocation7_spill]]  ;;  %s1161_s24 = smov %s852_s25 }
 0x2c1   : > { %s1158_s28 = sld [smem:[#allocation8_spill]]  ;;  %19 = sbr.rel (!%p17_p0) target bundleno = 5 (0x5), region = 93 }
 0x2c2   : > { %s1159_s29 = sld [smem:[#allocation9_spill]] }
 0x2c3   : > { %s1160_s30 = sld [smem:[#allocation10_spill]] }
 0x2c4   : > { %s1162_s25 = smov %s1155_s20 }
 0x2c6   :  { %587 = vsyncpa [#allocation4], 1 }
 0x2c7   :  { %589 = vsyncpa [#allocation4 + $0x1], 1 }

// kernel: tpu_custom_call.1
= control target key start
LH: loop header
LB: loop body
LE: loop exit
PB: predicated region body
PF: predicated region fallthrough
CT: control target
= control target key end

     0   :  { %12 = vsyncpa [#allocation4], 0  ;;  %s1132_s0 = inlined_call_operand.vmem [shape: f32[18,32], index: 0, kind: input, shape index: {}]   ;;  %s1133_s1 = inlined_call_operand.vmem [shape: f32[32,32], index: 1, kind: input, shape index: {}]   ;;  %s1134_s2 = inlined_call_operand.vmem [shape: f32[1,32], index: 2, kind: input, shape index: {}]   ;;  %s1135_s3 = inlined_call_operand.vmem [shape: f32[1,32], index: 3, kind: input, shape index: {}]   ;;  %s1136_s4 = inlined_call_operand.vmem [shape: f32[1,32], index: 4, kind: input, shape index: {}]   ;;  %s1137_s5 = inlined_call_operand.vmem [shape: f32[250,32], index: 5, kind: input, shape index: {}]   ;;  %s1138_s6 = inlined_call_operand.vmem [shape: f32[1,250], index: 6, kind: input, shape index: {}]   ;;  %s1139_s7 = inlined_call_operand.hbm [shape: f32[18,250], index: 7, kind: output, shape index: {}]  }
   0x1   :  { %14 = vsyncpa [#allocation4 + $0x1], 0  ;;  %s919_s24 = smov 0   ;;  %s921_s25 = smov 0  }
   0x2   :  { %s923_s26 = smov 0   ;;  %s925_s27 = smov 0  }
   0x3   :  { %s927_s28 = smov 0   ;;  %s929_s29 = smov 0  }
   0x4   :  { %s931_s30 = smov 0   ;;  %s933_s8 = smov 0  }
   0x5 LB: > { %1146 = sst [smem:[#allocation6_spill]] %s856_s26  ;;  %s662_s9 = sadd.s32 4294967295, %s876_s8   ;;  %s876_s8 = sphi %s933_s8, %s20_s8   ;;  %s872_s30 = sphi %s931_s30, %s1160_s30   ;;  %s868_s29 = sphi %s929_s29, %s1159_s29   ;;  %s864_s28 = sphi %s927_s28, %s1158_s28   ;;  %s860_s27 = sphi %s925_s27, %s1157_s27   ;;  %s856_s26 = sphi %s923_s26, %s1156_s26   ;;  %s852_s25 = sphi %s921_s25, %s1162_s25   ;;  %s848_s24 = sphi %s919_s24, %s1161_s24  }
   0x6   : > { %1147 = sst [smem:[#allocation7_spill]] %s868_s29  ;;  %s663_s10 = sadd.s32 4294967294, %s876_s8  }
   0x7   : > { %1148 = sst [smem:[#allocation8_spill]] %s872_s30  ;;  %s29_s11 = sadd.s32 1, %s868_s29 }
   0x8   : > { %p30_p0 = scmp.ge.s32.totalorder %s29_s11, 2  ;;  %s32_s12 = sadd.s32 1, %s872_s30 }
   0x9   : > { %p213_p1 = scmp.ne.s32.totalorder %s856_s26, %s852_s25  ;;  %p214_p2 = scmp.eq.s32.totalorder %s662_s9, 5 }
   0xa   : > { %s1164_s11 = smov (%p30_p0, %s29_s11), 0  ;;  %s1166_s12 = smov (!%p30_p0, %s32_s12), %s872_s30 }
   0xb   : > { %1149 = sst [smem:[#allocation9_spill]] %s1164_s11  ;;  %s199_s13 = ssub.s32 %s868_s29, %s1164_s11 }
   0xc   : > { %p970_p3 = por %p214_p2, %p213_p1  ;;  %p34_p4 = scmp.ge.s32.totalorder %s1166_s12, 3 }
   0xd   : > { %p219_p5 = scmp.ne.s32.totalorder %s852_s25, %s848_s24  ;;  %p220_p6 = scmp.eq.s32.totalorder %s663_s10, 5 }
   0xe   : > { %p666_p7 = scmp.ge.s32.totalorder %s876_s8, 1  ;;  %s1168_s12 = smov (%p34_p4, %s1166_s12), 0 }
   0xf   : > { %1151 = sst [smem:[#allocation10_spill]] %s1168_s12  ;;  %p979_p8 = por %p220_p6, %p219_p5 }
  0x10   : > { %p272_p9 = scmp.lt.s32.totalorder %s876_s8, 7  ;;  %s198_s16 = ssub.s32 %s872_s30, %s1168_s12 }
  0x11   : > { %s203_s17 = sadd.s32 1, %s856_s26  ;;  %s200_s18 = sor.u32 %s199_s13, %s198_s16 }
  0x12   : > { %p273_p10 = pnand %p666_p7, %p272_p9  ;;  %p201_p11 = scmp.eq.s32.totalorder %s200_s18, 0 }
  0x13   : > { %s1143_s20 = sand.u32 (!%p273_p10), 1, %s852_s25   ;;  %p311_p12 = scmp.lt.s32.totalorder (!%p273_p10), %s864_s28, 2 }
  0x14   : > { %s988_s19 = scalar_select %p201_p11, %s856_s26, %s203_s17  }
  0x15   : > { %276 = sbr.rel (%p273_p10) target bundleno = 695 (0x2b7), region = 48  ;;  %s994_s21 = sshll.u32 (!%p273_p10), %s1143_s20, 3 }
  0x16   : > { %1153 = sst [smem:[#allocation11_spill]] %s988_s19  ;;  %s669_s22 = sshll.u32 (!%p273_p10), %s860_s27, 4 }
  0x17   : > { %p316_p13 = scmp.lt.s32.totalorder (!%p273_p10), %s669_s22, 31  ;;  %p321_p0 = scmp.lt.s32.totalorder (!%p273_p10), %s860_s27, 1 }
  0x18   : > { %s310_s26 = scalar_lea.vmem (!%p273_p10), [#allocation3], %s994_s21  ;;  %p671_p1 = scmp.ne.s32.totalorder (!%p273_p10), %s860_s27, 0 }
  0x1a   : > { %s312_s23 = scalar_select %p311_p12, %s864_s28, 2 }
  0x1b   : > { %s1170_s22 = smov (!%p316_p13, %s669_s22), 31 }
  0x1c   : > { %s668_s9 = sshll.u32 %s312_s23, 3  ;;  %s670_s17 = sshll.u32 %s1170_s22, 3 }
  0x1d   : > { %s314_s16 = scalar_lea.vmem %s1132_s0, %s668_s9  ;;  %s1005_s11 = scalar_lea.vmem %s1137_s5, %s670_s17 }
  0x1e   : > { %s1008_s30 = scalar_select %p321_p0, %s860_s27, 1 }
  0x1f   : > { %327 = sbr.rel (%p671_p1) target bundleno = 500 (0x1f4), region = 52 }
  0x20   : > { %s323_s19 = scalar_lea.vmem %s1138_s6, %s1008_s30 }
  0x24   : > { %v332_v0 = vld [vmem:[%s1133_s1 + $0x18] sm:$0xff]  ;;  %vm337_vm0 = vcmask 261120   ;;  %v331_v1 = vld [vmem:[%s1133_s1 + $0x10] sm:$0xff]  ;;  %v330_v2 = vld [vmem:[%s1133_s1 + $0x8] sm:$0xff]  ;;  %v878_v48 = vmov 32.0  }
  0x25   : > { %672 = vmatpush.xpose.msk.msra.mxu0 %vm337_vm0, %v332_v0  ;;  %v329_v3 = vld [vmem:[%s1133_s1] sm:$0xff] }
  0x26   : > { %v328_v4 = vld [vmem:[%s314_s16] sm:$0xff] }
  0x27   : > { %v772_v5 = vld [vmem:[%s1134_s2] ss:$0 sm:$0xff] }
  0x29   : > { %673 = vmatpush.xpose.msk.msra.mxu0 %vm337_vm0, %v331_v1 }
  0x2d   : > { %674 = vmatpush.xpose.msk.msra.mxu0 %vm337_vm0, %v330_v2 }
  0x31   : > { %675 = vmatpush.xpose.msk.msra.mxu0 %vm337_vm0, %v329_v3 }
  0x34   : > { %676 = vmatmul.msk.f32.vlgmr.msra.gmra.mxu0 %vm337_vm0, %v328_v4 }
  0xb1   : > { %v370_v6 = vpop.f32.mrf.mxu0 }
  0xb2   : > { %v371_v7 = vadd.f32 %v772_v5, %v370_v6  ;;  %v773_v5 = vld [vmem:[%s1135_s3] ss:$0 sm:$0xff] }
  0xb4   : > { %v374_v8 = vmul.f32 0.70710677, %v371_v7  ;;  %v373_v44 = vmul.f32 0.5, %v371_v7  ;;  %v774_v7 = vld [vmem:[%s1136_s4] ss:$0 sm:$0xff] }
  0xb6   : > { %v375_v9 = vmul.f32 %v374_v8, %v374_v8 }
  0xb8   : > { %v376_v10 = vmin.f32 %v375_v9, 16.0 }
  0xba   : > { %v377_v11 = vmul.f32 2.1237322e-06, %v376_v10  ;;  %v388_v12 = vmul.f32 3.8918573e-05, %v376_v10 }
  0xbc   : > { %v378_v13 = vadd.f32 0.00028619796, %v377_v11  ;;  %v389_v14 = vadd.f32 0.001143296, %v388_v12 }
  0xbe   : > { %v379_v15 = vmul.f32 %v378_v13, %v376_v10  ;;  %v390_v16 = vmul.f32 %v389_v14, %v376_v10 }
  0xc0   : > { %v391_v17 = vadd.f32 0.014752088, %v390_v16  ;;  %v380_v18 = vadd.f32 0.0036580483, %v379_v15 }
  0xc2   : > { %v392_v19 = vmul.f32 %v391_v17, %v376_v10  ;;  %v381_v21 = vmul.f32 %v380_v18, %v376_v10 }
  0xc4   : > { %v393_v20 = vadd.f32 0.112945676, %v392_v19  ;;  %v382_v24 = vadd.f32 0.05243302, %v381_v21 }
  0xc6   : > { %v394_v22 = vmul.f32 %v393_v20, %v376_v10  ;;  %v383_v27 = vmul.f32 %v382_v24, %v376_v10 }
  0xc8   : > { %v395_v23 = vadd.f32 0.4994258, %v394_v22  ;;  %v384_v28 = vadd.f32 0.18741608, %v383_v27 }
  0xca   : > { %v396_v25 = vmul.f32 %v395_v23, %v376_v10  ;;  %v385_v30 = vmul.f32 %v384_v28, %v376_v10 }
  0xcc   : > { %v397_v26 = vadd.f32 1.0, %v396_v25  ;;  %v386_v34 = vadd.f32 1.1283791, %v385_v30 }
  0xce   : > { %775 = vrcp.f32 %v397_v26  ;;  %v409_v33 = vand.u32 2147483648, %v397_v26  ;;  %v407_v36 = vand.u32 2147483647, %v397_v26  ;;  %vm403_vm2 = vweird.f32 %v397_v26 }
  0xcf   : > { %v387_v39 = vmul.f32 %v386_v34, %v374_v8  ;;  %777 = vrcp.f32 %v878_v48 }
  0xd0   : > { %v410_v38 = vor.u32 1.1754944e-38, %v409_v33  ;;  %vm408_vm4 = vcmp.eq.f32.partialorder %v407_v36, 8.507059e+37 }
  0xd4   : > { %v776_v29 = vpop.eup %775 }
  0xd5   : > { %v399_v31 = vmul.f32 %v776_v29, %v397_v26  ;;  %vm404_vm1 = vweird.f32 %v776_v29  ;;  %v778_v49 = vpop.eup %777 }
  0xd6   : > { %vm405_vm3 = vmor %vm403_vm2, %vm404_vm1  ;;  %v421_v50 = vmul.f32 32.0, %v778_v49  ;;  %vm425_vm5 = vweird.f32 %v778_v49 }
  0xd7   : > { %v400_v32 = vsub.f32 1.0, %v399_v31 }
  0xd8   : > { %v422_v51 = vsub.f32 1.0, %v421_v50 }
  0xd9   : > { %v401_v35 = vmul.f32 %v776_v29, %v400_v32 }
  0xda   : > { %v423_v52 = vmul.f32 %v778_v49, %v422_v51 }
  0xdb   : > { %v402_v37 = vadd.f32 %v776_v29, %v401_v35 }
  0xdc   : > { %v424_v53 = vadd.f32 %v778_v49, %v423_v52 }
  0xdd   : > { %v406_v40 = vsel %vm405_vm3, %v776_v29, %v402_v37 }
  0xde   : > { %v411_v41 = vsel %vm408_vm4, %v410_v38, %v406_v40  ;;  %v426_v54 = vsel %vm425_vm5, %v778_v49, %v424_v53 }
  0xdf   : > { %v412_v42 = vmul.f32 %v411_v41, %v387_v39 }
  0xe1   : > { %v677_v43 = vclamps-f32 %v412_v42, 1.0 }
  0xe3   : > { %v415_v45 = vadd.f32 1.0, %v677_v43 }
  0xe5   : > { %v416_v46 = vmul.f32 %v415_v45, %v373_v44 }
  0xe7   : > { %v417_v47 = vsel %vm337_vm0, %v416_v46, 0.0 }
  0xe8   : > { %418 = vadd.xlane.f32.xlu0 %v417_v47 }
 0x15b   : > { %v419_v55 = vpop.xlane.xlu0 %418 }
 0x15c   : > { %v427_v56 = vmul.f32 %v426_v54, %v419_v55 }
 0x15e   : > { %v428_v57 = vsub.f32 %v416_v46, %v427_v56 }
 0x160   : > { %v429_v58 = vmul.f32 %v428_v57, %v428_v57 }
 0x162   : > { %v430_v59 = vsel %vm337_vm0, %v429_v58, 0.0 }
 0x163   : > { %431 = vadd.xlane.f32.xlu0 %v430_v59 }
 0x1d6   : > { %v432_v60 = vpop.xlane.xlu0 %431 }
 0x1d7   : > { %v433_v61 = vmul.f32 %v432_v60, %v426_v54 }
 0x1d9   : > { %v434_v62 = vadd.f32 1e-05, %v433_v61 }
 0x1db   : > { %779 = vrsqrt.f32 %v434_v62  ;;  %vm441_vm7 = vweird.f32 %v434_v62 }
 0x1e1   : > { %v780_v63 = vpop.eup %779 }
 0x1e2   : > { %v436_v0 = vmul.f32 %v780_v63, %v434_v62  ;;  %vm442_vm6 = vweird.f32 %v780_v63 }
 0x1e3   : > { %vm443_vm8 = vmor %vm441_vm7, %vm442_vm6 }
 0x1e4   : > { %v437_v1 = vmul.f32 %v780_v63, %v436_v0 }
 0x1e6   : > { %v438_v2 = vmul.f32 0.5, %v437_v1 }
 0x1e8   : > { %v439_v3 = vsub.f32 1.5, %v438_v2 }
 0x1ea   : > { %v440_v4 = vmul.f32 %v780_v63, %v439_v3 }
 0x1ec   : > { %v444_v6 = vsel %vm443_vm8, %v780_v63, %v440_v4 }
 0x1ed   : > { %v445_v8 = vmul.f32 %v444_v6, %v428_v57 }
 0x1ef   : > { %v450_v9 = vmul.f32 %v773_v5, %v445_v8 }
 0x1f1   : > { %v455_v10 = vadd.f32 %v774_v7, %v450_v9 }
 0x1f3   : > { %456 = vst.msk [vmem:[#allocation2] sm:$0xff] %vm337_vm0, %v455_v10 }
 0x1f4 PF: > { %v473_v11 = vld [vmem:[%s1005_s11 + $0x78] sm:$0xff]  ;;  %vm478_vm9 = vcmask 261120   ;;  %v472_v12 = vld [vmem:[%s1005_s11 + $0x70] sm:$0xff]  ;;  %v471_v13 = vld [vmem:[%s1005_s11 + $0x68] sm:$0xff]  ;;  %s696_s22 = sshll.u32 %s864_s28, 1 }
 0x1f5   : > { %678 = vmatpush.xpose.msk.msra.mxu0 %vm478_vm9, %v473_v11  ;;  %v470_v14 = vld [vmem:[%s1005_s11 + $0x60] sm:$0xff]  ;;  %v469_v15 = vld [vmem:[%s1005_s11 + $0x58] sm:$0xff]  ;;  %v468_v16 = vld [vmem:[%s1005_s11 + $0x50] sm:$0xff]  ;;  %s562_s9 = sadd.s32 %s860_s27, %s696_s22  ;;  %s1154_s27 = sand.u32 1, %s852_s25  }
 0x1f6   : > { %v467_v17 = vld [vmem:[%s1005_s11 + $0x48] sm:$0xff]  ;;  %v466_v18 = vld [vmem:[%s1005_s11 + $0x40] sm:$0xff]  ;;  %v465_v19 = vld [vmem:[%s1005_s11 + $0x38] sm:$0xff]  ;;  %s697_s29 = sshll.u32 %s562_s9, 3  ;;  %s552_s28 = scalar_lea.sflag [#allocation4], %s1154_s27 }
 0x1f7   : > { %v464_v20 = vld [vmem:[%s1005_s11 + $0x30] sm:$0xff]  ;;  %v463_v21 = vld [vmem:[%s1005_s11 + $0x28] sm:$0xff]  ;;  %v462_v22 = vld [vmem:[%s1005_s11 + $0x20] sm:$0xff]  ;;  %s564_s17 = scalar_lea.hbm %s1139_s7, %s697_s29  ;;  %s802_s22 = scalar_lea.hbm %s1139_s7, 48 }
 0x1f8   : > { %v461_v23 = vld [vmem:[%s1005_s11 + $0x18] sm:$0xff]  ;;  %v460_v24 = vld [vmem:[%s1005_s11 + $0x10] sm:$0xff]  ;;  %v459_v25 = vld [vmem:[%s1005_s11 + $0x8] sm:$0xff]  ;;  %s568_s23 = sshll.u32 %s564_s17, 4  ;;  %s569_s23 = int_to_ptr.hbm [resolvable:$true] %s568_s23 }
 0x1f9   : > { %679 = vmatpush.xpose.msk.msra.mxu0 %vm478_vm9, %v472_v12  ;;  %v458_v26 = vld [vmem:[%s1005_s11] sm:$0xff]  ;;  %s566_s11 = sshll.u32 %s310_s26, 4  ;;  %s796_s10 = sshra.s32 %s569_s23, 4  ;;  %s567_s11 = int_to_ptr.vmem [resolvable:$true] %s566_s11  ;;  %s797_s10 = int_to_ptr.hbm [resolvable:$true] %s796_s10 }
 0x1fa   : > { %v457_v27 = vld [vmem:[#allocation2] sm:$0xff]  ;;  %s798_s12 = scalar_lea.hbm %s797_s10, 8  ;;  %p803_p6 = scmp.lt.s32.totalorder %s797_s10, %s1139_s7 }
 0x1fb   : > { %v781_v28 = vld [vmem:[%s323_s19] ss:$0 sm:$0xff]  ;;  %p799_p2 = scmp.ne.s32.totalorder %s797_s10, %s798_s12  ;;  %p804_p7 = scmp.lt.s32.totalorder %s802_s22, %s798_s12 }
 0x1fd   : > { %680 = vmatpush.xpose.msk.msra.mxu0 %vm478_vm9, %v471_v13  ;;  %p800_p4 = pnand %p799_p2, %p970_p3  ;;  %p805_p9 = por %p804_p7, %p803_p6 }
 0x1ff   : > { %p801_p5 = pneg %p800_p4 }
 0x201   : > { %681 = vmatpush.xpose.msk.msra.mxu0 %vm478_vm9, %v470_v14  ;;  %p806_p10 = pnand %p805_p9, %p801_p5 }
 0x205   : > { %682 = vmatpush.xpose.msk.msra.mxu0 %vm478_vm9, %v469_v15 }
 0x209   : > { %683 = vmatpush.xpose.msk.msra.mxu0 %vm478_vm9, %v468_v16 }
 0x20d   : > { %684 = vmatpush.xpose.msk.msra.mxu0 %vm478_vm9, %v467_v17 }
 0x211   : > { %685 = vmatpush.xpose.msk.msra.mxu0 %vm478_vm9, %v466_v18 }
 0x215   : > { %686 = vmatpush.xpose.msk.msra.mxu0 %vm478_vm9, %v465_v19 }
 0x219   : > { %687 = vmatpush.xpose.msk.msra.mxu0 %vm478_vm9, %v464_v20 }
 0x21d   : > { %688 = vmatpush.xpose.msk.msra.mxu0 %vm478_vm9, %v463_v21 }
 0x221   : > { %689 = vmatpush.xpose.msk.msra.mxu0 %vm478_vm9, %v462_v22 }
 0x225   : > { %690 = vmatpush.xpose.msk.msra.mxu0 %vm478_vm9, %v461_v23 }
 0x229   : > { %691 = vmatpush.xpose.msk.msra.mxu0 %vm478_vm9, %v460_v24 }
 0x22d   : > { %692 = vmatpush.xpose.msk.msra.mxu0 %vm478_vm9, %v459_v25 }
 0x231   : > { %693 = vmatpush.xpose.msk.msra.mxu0 %vm478_vm9, %v458_v26 }
 0x234   : > { %694 = vmatmul.msk.f32.vlgmr.msra.gmra.mxu0 %vm478_vm9, %v457_v27 }
 0x2b1   : > { %v547_v29 = vpop.f32.mrf.mxu0 }
 0x2b2   : > { %v548_v30 = vadd.f32 %v781_v28, %v547_v29 }
 0x2b4   : > { %550 = vst [vmem:[%s310_s26] sm:$0xff] %v548_v30 }
 0x2b5   : > { %809 = shalt.err (!%p806_p10)
}
 0x2b6   : > { %700 = dma.vmem_to_hbm [thread:$0]  (%p970_p3), %s567_s11, 128, %s569_s23, %s552_s28  }
 0x2b7 PF: > { %p706_p11 = scmp.ge.s32.totalorder %s876_s8, 2  ;;  %s580_s26 = sand.u32 1, %s848_s24  }
 0x2b8   : > { %s581_s21 = scalar_lea.sflag [#allocation4], %s580_s26 }
 0x2b9   : > { %p703_p12 = pnand %p706_p11, %p979_p8 }
 0x2bb   : > { %p704_p13 = pneg %p703_p12 }
 0x2bd   : > { %843 = dma.done.wait (%p704_p13), %s581_s21, 128  }
 0x2be   : > { %845 = vsyncadd (%p704_p13), %s581_s21, 4294967168  ;;  %s20_s8 = sadd.s32 1, %s876_s8   ;;  %s1155_s20 = sld [smem:[#allocation6_spill]] }
 0x2bf   : > { %p17_p0 = scmp.ge.s32.totalorder %s20_s8, 8   ;;  %s1156_s26 = sld [smem:[#allocation11_spill]] }
 0x2c0   : > { %s1157_s27 = sld [smem:[#allocation7_spill]]  ;;  %s1161_s24 = smov %s852_s25 }
 0x2c1   : > { %s1158_s28 = sld [smem:[#allocation8_spill]]  ;;  %19 = sbr.rel (!%p17_p0) target bundleno = 5 (0x5), region = 93 }
 0x2c2   : > { %s1159_s29 = sld [smem:[#allocation9_spill]] }
 0x2c3   : > { %s1160_s30 = sld [smem:[#allocation10_spill]] }
 0x2c4   : > { %s1162_s25 = smov %s1155_s20 }
 0x2c6   :  { %587 = vsyncpa [#allocation4], 1 }
 0x2c7   :  { %589 = vsyncpa [#allocation4 + $0x1], 1 }

</bundles_post_ra>
